<compile_context>
chip_gen: v7x
topology: tpu7x:2x2x1
jax: 0.10.0
libtpu: 0.0.40
codegen_flags: <defaults>
</compile_context>

<pallas_src>
import jax
import jax.numpy as jnp
from jax.experimental import pallas as pl
from jax.experimental.pallas import tpu as pltpu


LANES = 128
GROUP = 3 * LANES        # 384 interleaved values (= 128 complete points) per row
TILE_R_MAX = 1024        # rows per grid step -> block = 1024*384*4 B = 1.5 MiB


def _round_up(x, m):
    return ((x + m - 1) // m) * m


def transform_kernel(p_ref, x_ref, o_ref):
    """Affine transform on interleaved xyz data.

    p_ref : SMEM (12,) f32 = [R00..R22 (row-major), t0, t1, t2]
    x_ref : VMEM (tile_r, 384) f32; lane l of a row holds coordinate (l % 3) of
            point (row*128 + l//3)  (row-major flattening of the [N, 3] input)
    o_ref : VMEM (tile_r, 384) f32, same layout
    """
    x = x_ref[...]
    w = x.shape[-1]                                   # 384

    # Per-lane output coordinate index (0/1/2); identical for every row & block
    # because the row width (384) is a multiple of 3.
    lane = jax.lax.broadcasted_iota(jnp.int32, (1, w), 1)
    c = lane % 3

    p = [p_ref[j] for j in range(12)]                 # 12 scalars from SMEM
    t_plane = jnp.where(c == 0, p[9], jnp.where(c == 1, p[10], p[11]))

    # out[l] = sum_k R[c, k] * x[3*(l//3) + k] + t[c].
    # Needed sources sit within +/-2 lanes of l, so five lane rotations of the
    # block cover them.  The coefficient plane per rotation is built from the
    # *same* pltpu.roll applied to the lane iota, which makes the math correct
    # for either rotation direction convention; wrapped lanes at the row edges
    # end up >2 away from their group and are masked to zero.
    acc = None
    for s in (0, 1, 2, w - 2, w - 1):
        if s == 0:
            src, xs = lane, x
        else:
            src = pltpu.roll(lane, s, axis=1)         # original lane index now at l
            xs = pltpu.roll(x, s, axis=1)
        k = c + (src - lane)                          # source coordinate if same point
        valid = (k >= 0) & (k <= 2)                   # same point & not wrapped
        ridx = 3 * c + k                              # row-major index into R
        coef = jnp.zeros((1, w), jnp.float32)
        for j in range(9):
            coef = jnp.where(ridx == j, p[j], coef)
        coef = jnp.where(valid, coef, jnp.float32(0.0))
        term = coef * xs                              # (1, w) broadcasts over sublanes
        acc = term if acc is None else acc + term
    o_ref[...] = acc + t_plane


def _rot_mat(rvec):
    # Identical math to TransformLayer.rot_mats (no epsilon guard, matching PyTorch).
    theta = jnp.sqrt(jnp.sum(rvec * rvec))
    r = rvec / theta
    return jnp.stack(
        [
            1.0 - 2.0 * r[1] ** 2 - 2.0 * r[2] ** 2,
            2.0 * (r[0] * r[1] - r[2] * r[3]),
            2.0 * (r[0] * r[2] + r[1] * r[3]),
            2.0 * (r[0] * r[1] + r[2] * r[3]),
            1.0 - 2.0 * r[0] ** 2 - 2.0 * r[2] ** 2,
            2.0 * (r[1] * r[2] - r[0] * r[3]),
            2.0 * (r[0] * r[2] - r[1] * r[3]),
            2.0 * (r[0] * r[3] + r[1] * r[2]),
            1.0 - 2.0 * r[0] ** 2 - 2.0 * r[1] ** 2,
        ]
    ).reshape(3, 3)


@jax.jit
def transform_layer_forward(xyz, rvec, tvec):
    """xyz: [N, 3] -> [N, 3] transformed points (y = xyz @ R(rvec).T + tvec)."""
    N = xyz.shape[0]
    if N == 0:
        return jnp.zeros((0, 3), jnp.float32)

    xyz = xyz.astype(jnp.float32)
    R = _rot_mat(rvec.astype(jnp.float32))
    params = jnp.concatenate(
        [R.reshape(9), tvec.astype(jnp.float32).reshape(3)]
    )  # (12,) -> SMEM

    total = 3 * N
    flat = xyz.reshape(total)                         # row-major bitcast, free

    n_rows = pl.cdiv(total, GROUP)
    needs_pad = (n_rows * GROUP) != total             # i.e. N % 128 != 0
    if needs_pad:
        # Unaligned N: one XLA pad copy in, one slice copy out.  Callers that can
        # keep N a multiple of 128 get the zero-copy path (reshape in / out only).
        n_rows = _round_up(n_rows, 8)
        flat = jnp.pad(flat, (0, n_rows * GROUP - total))
    x2d = flat.reshape(n_rows, GROUP)                 # free when not padded

    # Tile selection:
    #  * >= 2 grid steps whenever n_rows > 8 so a v7x chip can shard the
    #    (memory-bound) point axis across both TensorCores,
    #  * blocks capped at TILE_R_MAX rows -> <= 6 MiB double-buffered pipeline VMEM,
    #  * no rounding of n_rows up to a tile_r multiple: the partial last block is
    #    masked by Pallas, so padded traffic stays < 8 rows.
    if n_rows > 8:
        n_steps = max(2, pl.cdiv(n_rows, TILE_R_MAX))
        tile_r = min(_round_up(pl.cdiv(n_rows, n_steps), 8), TILE_R_MAX)
        if tile_r >= n_rows:                          # safety net
            tile_r = n_rows
    else:
        tile_r = n_rows                               # block == full array -> always legal
    grid = (pl.cdiv(n_rows, tile_r),)

    out2d = pl.pallas_call(
        transform_kernel,
        out_shape=jax.ShapeDtypeStruct((n_rows, GROUP), jnp.float32),
        grid=grid,
        in_specs=[
            pl.BlockSpec(memory_space=pltpu.MemorySpace.SMEM),       # 12 scalars
            pl.BlockSpec((tile_r, GROUP), lambda i: (i, 0)),         # point block
        ],
        out_specs=pl.BlockSpec((tile_r, GROUP), lambda i: (i, 0)),
        compiler_params=pltpu.CompilerParams(
            dimension_semantics=("parallel",),        # independent tiles
            vmem_limit_bytes=32 * 1024 * 1024,        # headroom for rotate temporaries
        ),
        cost_estimate=pl.CostEstimate(
            flops=18 * n_rows * LANES,
            transcendentals=0,
            bytes_accessed=24 * n_rows * LANES,
        ),
    )(params, x2d)

    out_flat = out2d.reshape(n_rows * GROUP)          # free
    if needs_pad:
        out_flat = out_flat[:total]                   # padded lanes hold tvec; drop them
    return out_flat.reshape(N, 3)                     # free


if __name__ == "__main__":
    key = jax.random.PRNGKey(0)
    k_xyz, k_r, k_t = jax.random.split(key, 3)

    def reference(xyz, rvec, tvec):
        R = _rot_mat(rvec)
        return jnp.sum(xyz[..., None, :3] * R[None, :3, :3], axis=-1) + tvec

    # Module-init parameters (identity quaternion, zero offset) + a general pose.
    rvec_id = jnp.array([0.0, 0.0, 0.0, 1.0], dtype=jnp.float32)
    tvec_id = jnp.zeros((3,), dtype=jnp.float32)
    rvec = jax.random.normal(k_r, (4,), dtype=jnp.float32)
    tvec = jax.random.normal(k_t, (3,), dtype=jnp.float32)

    # N = 8 exercises the small / padded path; N = 1152 (multiple of 128) exercises
    # the zero-copy path with a 2-step grid and a partial last block.
    cases = [
        (8, rvec_id, tvec_id),
        (8, rvec, tvec),
        (1152, rvec, tvec),
    ]
    for N, rv, tv in cases:
        xyz = jax.random.normal(jax.random.fold_in(k_xyz, N), (N, 3), dtype=jnp.float32)
        out = jax.block_until_ready(transform_layer_forward(xyz, rv, tv))
        ref = reference(xyz, rv, tv)
        assert out.shape == (N, 3)
        assert jnp.allclose(out, ref, atol=1e-5, rtol=1e-5), f"mismatch at N={N}"

    print("KERNEL_OK")
</pallas_src>

<mosaic_0001>
module attributes {stable_mosaic.version = 11 : i64} {
  func.func @transform_kernel(%arg0: i32, %arg1: memref<12xf32, #tpu.memory_space<smem>>, %arg2: memref<8x384xf32, #tpu.memory_space<vmem>>, %arg3: memref<8x384xf32, #tpu.memory_space<vmem>>) attributes {dimension_semantics = [#tpu.dimension_semantics<parallel>], iteration_bounds = array<i64: 1>, scalar_prefetch = 0 : i64, scratch_operands = 0 : i64, tpu.core_type = #tpu.core_type<tc>, window_params = [{transform_indices = @transform_0, window_bounds = array<i64: 12>}, {transform_indices = @transform_1, window_bounds = array<i64: 8, 384>}, {transform_indices = @transform_2, window_bounds = array<i64: 8, 384>}]} {
    %c0 = arith.constant 0 : index
    %c0_0 = arith.constant 0 : index
    %0 = vector.load %arg2[%c0, %c0_0] : memref<8x384xf32, #tpu.memory_space<vmem>>, vector<8x384xf32>
    %1 = tpu.iota {dimensions = array<i32: 1>} : vector<1x384xi32>
    %c3_i32 = arith.constant 3 : i32
    %c0_i32 = arith.constant 0 : i32
    %2 = arith.cmpi eq, %c3_i32, %c0_i32 : i32
    %c1_i32 = arith.constant 1 : i32
    %3 = arith.select %2, %c1_i32, %c3_i32 : i32
    %4 = vector.broadcast %3 : i32 to vector<1x384xi32>
    %5 = arith.remsi %1, %4 : vector<1x384xi32>
    %c0_i32_1 = arith.constant 0 : i32
    %6 = vector.broadcast %c0_i32_1 : i32 to vector<1x384xi32>
    %7 = arith.cmpi ne, %5, %6 : vector<1x384xi32>
    %c0_i32_2 = arith.constant 0 : i32
    %8 = vector.broadcast %c0_i32_2 : i32 to vector<1x384xi32>
    %9 = arith.cmpi slt, %5, %8 : vector<1x384xi32>
    %c0_i32_3 = arith.constant 0 : i32
    %10 = arith.cmpi slt, %3, %c0_i32_3 : i32
    %11 = vector.broadcast %10 : i1 to vector<1x384xi1>
    %12 = vector.broadcast %11 : vector<1x384xi1> to vector<1x384xi1>
    %13 = arith.xori %9, %12 : vector<1x384xi1>
    %14 = arith.andi %13, %7 : vector<1x384xi1>
    %15 = vector.broadcast %3 : i32 to vector<1x384xi32>
    %16 = arith.addi %5, %15 : vector<1x384xi32>
    %17 = arith.select %14, %16, %5 : vector<1x384xi1>, vector<1x384xi32>
    %c0_4 = arith.constant 0 : index
    %18 = memref.load %arg1[%c0_4] : memref<12xf32, #tpu.memory_space<smem>>
    %c1 = arith.constant 1 : index
    %19 = memref.load %arg1[%c1] : memref<12xf32, #tpu.memory_space<smem>>
    %c2 = arith.constant 2 : index
    %20 = memref.load %arg1[%c2] : memref<12xf32, #tpu.memory_space<smem>>
    %c3 = arith.constant 3 : index
    %21 = memref.load %arg1[%c3] : memref<12xf32, #tpu.memory_space<smem>>
    %c4 = arith.constant 4 : index
    %22 = memref.load %arg1[%c4] : memref<12xf32, #tpu.memory_space<smem>>
    %c5 = arith.constant 5 : index
    %23 = memref.load %arg1[%c5] : memref<12xf32, #tpu.memory_space<smem>>
    %c6 = arith.constant 6 : index
    %24 = memref.load %arg1[%c6] : memref<12xf32, #tpu.memory_space<smem>>
    %c7 = arith.constant 7 : index
    %25 = memref.load %arg1[%c7] : memref<12xf32, #tpu.memory_space<smem>>
    %c8 = arith.constant 8 : index
    %26 = memref.load %arg1[%c8] : memref<12xf32, #tpu.memory_space<smem>>
    %c9 = arith.constant 9 : index
    %27 = memref.load %arg1[%c9] : memref<12xf32, #tpu.memory_space<smem>>
    %c10 = arith.constant 10 : index
    %28 = memref.load %arg1[%c10] : memref<12xf32, #tpu.memory_space<smem>>
    %c11 = arith.constant 11 : index
    %29 = memref.load %arg1[%c11] : memref<12xf32, #tpu.memory_space<smem>>
    %c0_i32_5 = arith.constant 0 : i32
    %30 = vector.broadcast %c0_i32_5 : i32 to vector<1x384xi32>
    %31 = arith.cmpi eq, %17, %30 : vector<1x384xi32>
    %c1_i32_6 = arith.constant 1 : i32
    %32 = vector.broadcast %c1_i32_6 : i32 to vector<1x384xi32>
    %33 = arith.cmpi eq, %17, %32 : vector<1x384xi32>
    %34 = vector.broadcast %28 : f32 to vector<1x384xf32>
    %35 = vector.broadcast %29 : f32 to vector<1x384xf32>
    %36 = arith.select %33, %34, %35 : vector<1x384xi1>, vector<1x384xf32>
    %37 = vector.broadcast %27 : f32 to vector<1x384xf32>
    %38 = arith.select %31, %37, %36 : vector<1x384xi1>, vector<1x384xf32>
    %39 = arith.subi %1, %1 : vector<1x384xi32>
    %40 = arith.addi %17, %39 : vector<1x384xi32>
    %c0_i32_7 = arith.constant 0 : i32
    %41 = vector.broadcast %c0_i32_7 : i32 to vector<1x384xi32>
    %42 = arith.cmpi sge, %40, %41 : vector<1x384xi32>
    %c2_i32 = arith.constant 2 : i32
    %43 = vector.broadcast %c2_i32 : i32 to vector<1x384xi32>
    %44 = arith.cmpi sle, %40, %43 : vector<1x384xi32>
    %45 = arith.andi %42, %44 : vector<1x384xi1>
    %c3_i32_8 = arith.constant 3 : i32
    %46 = vector.broadcast %c3_i32_8 : i32 to vector<1x384xi32>
    %47 = arith.muli %46, %17 : vector<1x384xi32>
    %48 = arith.addi %47, %40 : vector<1x384xi32>
    %cst = arith.constant 0.000000e+00 : f32
    %49 = vector.broadcast %cst : f32 to vector<1x384xf32>
    %c0_i32_9 = arith.constant 0 : i32
    %50 = vector.broadcast %c0_i32_9 : i32 to vector<1x384xi32>
    %51 = arith.cmpi eq, %48, %50 : vector<1x384xi32>
    %52 = vector.broadcast %18 : f32 to vector<1x384xf32>
    %53 = arith.select %51, %52, %49 : vector<1x384xi1>, vector<1x384xf32>
    %c1_i32_10 = arith.constant 1 : i32
    %54 = vector.broadcast %c1_i32_10 : i32 to vector<1x384xi32>
    %55 = arith.cmpi eq, %48, %54 : vector<1x384xi32>
    %56 = vector.broadcast %19 : f32 to vector<1x384xf32>
    %57 = arith.select %55, %56, %53 : vector<1x384xi1>, vector<1x384xf32>
    %c2_i32_11 = arith.constant 2 : i32
    %58 = vector.broadcast %c2_i32_11 : i32 to vector<1x384xi32>
    %59 = arith.cmpi eq, %48, %58 : vector<1x384xi32>
    %60 = vector.broadcast %20 : f32 to vector<1x384xf32>
    %61 = arith.select %59, %60, %57 : vector<1x384xi1>, vector<1x384xf32>
    %c3_i32_12 = arith.constant 3 : i32
    %62 = vector.broadcast %c3_i32_12 : i32 to vector<1x384xi32>
    %63 = arith.cmpi eq, %48, %62 : vector<1x384xi32>
    %64 = vector.broadcast %21 : f32 to vector<1x384xf32>
    %65 = arith.select %63, %64, %61 : vector<1x384xi1>, vector<1x384xf32>
    %c4_i32 = arith.constant 4 : i32
    %66 = vector.broadcast %c4_i32 : i32 to vector<1x384xi32>
    %67 = arith.cmpi eq, %48, %66 : vector<1x384xi32>
    %68 = vector.broadcast %22 : f32 to vector<1x384xf32>
    %69 = arith.select %67, %68, %65 : vector<1x384xi1>, vector<1x384xf32>
    %c5_i32 = arith.constant 5 : i32
    %70 = vector.broadcast %c5_i32 : i32 to vector<1x384xi32>
    %71 = arith.cmpi eq, %48, %70 : vector<1x384xi32>
    %72 = vector.broadcast %23 : f32 to vector<1x384xf32>
    %73 = arith.select %71, %72, %69 : vector<1x384xi1>, vector<1x384xf32>
    %c6_i32 = arith.constant 6 : i32
    %74 = vector.broadcast %c6_i32 : i32 to vector<1x384xi32>
    %75 = arith.cmpi eq, %48, %74 : vector<1x384xi32>
    %76 = vector.broadcast %24 : f32 to vector<1x384xf32>
    %77 = arith.select %75, %76, %73 : vector<1x384xi1>, vector<1x384xf32>
    %c7_i32 = arith.constant 7 : i32
    %78 = vector.broadcast %c7_i32 : i32 to vector<1x384xi32>
    %79 = arith.cmpi eq, %48, %78 : vector<1x384xi32>
    %80 = vector.broadcast %25 : f32 to vector<1x384xf32>
    %81 = arith.select %79, %80, %77 : vector<1x384xi1>, vector<1x384xf32>
    %c8_i32 = arith.constant 8 : i32
    %82 = vector.broadcast %c8_i32 : i32 to vector<1x384xi32>
    %83 = arith.cmpi eq, %48, %82 : vector<1x384xi32>
    %84 = vector.broadcast %26 : f32 to vector<1x384xf32>
    %85 = arith.select %83, %84, %81 : vector<1x384xi1>, vector<1x384xf32>
    %cst_13 = arith.constant 0.000000e+00 : f32
    %86 = vector.broadcast %cst_13 : f32 to vector<1x384xf32>
    %87 = arith.select %45, %85, %86 : vector<1x384xi1>, vector<1x384xf32>
    %88 = vector.broadcast %87 : vector<1x384xf32> to vector<8x384xf32>
    %89 = arith.mulf %88, %0 : vector<8x384xf32>
    %c1_i32_14 = arith.constant 1 : i32
    %90 = tpu.dynamic_rotate %1 by %c1_i32_14 dim 1 : vector<1x384xi32>, i32 -> vector<1x384xi32>
    %c1_i32_15 = arith.constant 1 : i32
    %91 = tpu.dynamic_rotate %0 by %c1_i32_15 dim 1 : vector<8x384xf32>, i32 -> vector<8x384xf32>
    %92 = arith.subi %90, %1 : vector<1x384xi32>
    %93 = arith.addi %17, %92 : vector<1x384xi32>
    %c0_i32_16 = arith.constant 0 : i32
    %94 = vector.broadcast %c0_i32_16 : i32 to vector<1x384xi32>
    %95 = arith.cmpi sge, %93, %94 : vector<1x384xi32>
    %c2_i32_17 = arith.constant 2 : i32
    %96 = vector.broadcast %c2_i32_17 : i32 to vector<1x384xi32>
    %97 = arith.cmpi sle, %93, %96 : vector<1x384xi32>
    %98 = arith.andi %95, %97 : vector<1x384xi1>
    %c3_i32_18 = arith.constant 3 : i32
    %99 = vector.broadcast %c3_i32_18 : i32 to vector<1x384xi32>
    %100 = arith.muli %99, %17 : vector<1x384xi32>
    %101 = arith.addi %100, %93 : vector<1x384xi32>
    %cst_19 = arith.constant 0.000000e+00 : f32
    %102 = vector.broadcast %cst_19 : f32 to vector<1x384xf32>
    %c0_i32_20 = arith.constant 0 : i32
    %103 = vector.broadcast %c0_i32_20 : i32 to vector<1x384xi32>
    %104 = arith.cmpi eq, %101, %103 : vector<1x384xi32>
    %105 = vector.broadcast %18 : f32 to vector<1x384xf32>
    %106 = arith.select %104, %105, %102 : vector<1x384xi1>, vector<1x384xf32>
    %c1_i32_21 = arith.constant 1 : i32
    %107 = vector.broadcast %c1_i32_21 : i32 to vector<1x384xi32>
    %108 = arith.cmpi eq, %101, %107 : vector<1x384xi32>
    %109 = vector.broadcast %19 : f32 to vector<1x384xf32>
    %110 = arith.select %108, %109, %106 : vector<1x384xi1>, vector<1x384xf32>
    %c2_i32_22 = arith.constant 2 : i32
    %111 = vector.broadcast %c2_i32_22 : i32 to vector<1x384xi32>
    %112 = arith.cmpi eq, %101, %111 : vector<1x384xi32>
    %113 = vector.broadcast %20 : f32 to vector<1x384xf32>
    %114 = arith.select %112, %113, %110 : vector<1x384xi1>, vector<1x384xf32>
    %c3_i32_23 = arith.constant 3 : i32
    %115 = vector.broadcast %c3_i32_23 : i32 to vector<1x384xi32>
    %116 = arith.cmpi eq, %101, %115 : vector<1x384xi32>
    %117 = vector.broadcast %21 : f32 to vector<1x384xf32>
    %118 = arith.select %116, %117, %114 : vector<1x384xi1>, vector<1x384xf32>
    %c4_i32_24 = arith.constant 4 : i32
    %119 = vector.broadcast %c4_i32_24 : i32 to vector<1x384xi32>
    %120 = arith.cmpi eq, %101, %119 : vector<1x384xi32>
    %121 = vector.broadcast %22 : f32 to vector<1x384xf32>
    %122 = arith.select %120, %121, %118 : vector<1x384xi1>, vector<1x384xf32>
    %c5_i32_25 = arith.constant 5 : i32
    %123 = vector.broadcast %c5_i32_25 : i32 to vector<1x384xi32>
    %124 = arith.cmpi eq, %101, %123 : vector<1x384xi32>
    %125 = vector.broadcast %23 : f32 to vector<1x384xf32>
    %126 = arith.select %124, %125, %122 : vector<1x384xi1>, vector<1x384xf32>
    %c6_i32_26 = arith.constant 6 : i32
    %127 = vector.broadcast %c6_i32_26 : i32 to vector<1x384xi32>
    %128 = arith.cmpi eq, %101, %127 : vector<1x384xi32>
    %129 = vector.broadcast %24 : f32 to vector<1x384xf32>
    %130 = arith.select %128, %129, %126 : vector<1x384xi1>, vector<1x384xf32>
    %c7_i32_27 = arith.constant 7 : i32
    %131 = vector.broadcast %c7_i32_27 : i32 to vector<1x384xi32>
    %132 = arith.cmpi eq, %101, %131 : vector<1x384xi32>
    %133 = vector.broadcast %25 : f32 to vector<1x384xf32>
    %134 = arith.select %132, %133, %130 : vector<1x384xi1>, vector<1x384xf32>
    %c8_i32_28 = arith.constant 8 : i32
    %135 = vector.broadcast %c8_i32_28 : i32 to vector<1x384xi32>
    %136 = arith.cmpi eq, %101, %135 : vector<1x384xi32>
    %137 = vector.broadcast %26 : f32 to vector<1x384xf32>
    %138 = arith.select %136, %137, %134 : vector<1x384xi1>, vector<1x384xf32>
    %cst_29 = arith.constant 0.000000e+00 : f32
    %139 = vector.broadcast %cst_29 : f32 to vector<1x384xf32>
    %140 = arith.select %98, %138, %139 : vector<1x384xi1>, vector<1x384xf32>
    %141 = vector.broadcast %140 : vector<1x384xf32> to vector<8x384xf32>
    %142 = arith.mulf %141, %91 : vector<8x384xf32>
    %143 = arith.addf %89, %142 : vector<8x384xf32>
    %c2_i32_30 = arith.constant 2 : i32
    %144 = tpu.dynamic_rotate %1 by %c2_i32_30 dim 1 : vector<1x384xi32>, i32 -> vector<1x384xi32>
    %c2_i32_31 = arith.constant 2 : i32
    %145 = tpu.dynamic_rotate %0 by %c2_i32_31 dim 1 : vector<8x384xf32>, i32 -> vector<8x384xf32>
    %146 = arith.subi %144, %1 : vector<1x384xi32>
    %147 = arith.addi %17, %146 : vector<1x384xi32>
    %c0_i32_32 = arith.constant 0 : i32
    %148 = vector.broadcast %c0_i32_32 : i32 to vector<1x384xi32>
    %149 = arith.cmpi sge, %147, %148 : vector<1x384xi32>
    %c2_i32_33 = arith.constant 2 : i32
    %150 = vector.broadcast %c2_i32_33 : i32 to vector<1x384xi32>
    %151 = arith.cmpi sle, %147, %150 : vector<1x384xi32>
    %152 = arith.andi %149, %151 : vector<1x384xi1>
    %c3_i32_34 = arith.constant 3 : i32
    %153 = vector.broadcast %c3_i32_34 : i32 to vector<1x384xi32>
    %154 = arith.muli %153, %17 : vector<1x384xi32>
    %155 = arith.addi %154, %147 : vector<1x384xi32>
    %cst_35 = arith.constant 0.000000e+00 : f32
    %156 = vector.broadcast %cst_35 : f32 to vector<1x384xf32>
    %c0_i32_36 = arith.constant 0 : i32
    %157 = vector.broadcast %c0_i32_36 : i32 to vector<1x384xi32>
    %158 = arith.cmpi eq, %155, %157 : vector<1x384xi32>
    %159 = vector.broadcast %18 : f32 to vector<1x384xf32>
    %160 = arith.select %158, %159, %156 : vector<1x384xi1>, vector<1x384xf32>
    %c1_i32_37 = arith.constant 1 : i32
    %161 = vector.broadcast %c1_i32_37 : i32 to vector<1x384xi32>
    %162 = arith.cmpi eq, %155, %161 : vector<1x384xi32>
    %163 = vector.broadcast %19 : f32 to vector<1x384xf32>
    %164 = arith.select %162, %163, %160 : vector<1x384xi1>, vector<1x384xf32>
    %c2_i32_38 = arith.constant 2 : i32
    %165 = vector.broadcast %c2_i32_38 : i32 to vector<1x384xi32>
    %166 = arith.cmpi eq, %155, %165 : vector<1x384xi32>
    %167 = vector.broadcast %20 : f32 to vector<1x384xf32>
    %168 = arith.select %166, %167, %164 : vector<1x384xi1>, vector<1x384xf32>
    %c3_i32_39 = arith.constant 3 : i32
    %169 = vector.broadcast %c3_i32_39 : i32 to vector<1x384xi32>
    %170 = arith.cmpi eq, %155, %169 : vector<1x384xi32>
    %171 = vector.broadcast %21 : f32 to vector<1x384xf32>
    %172 = arith.select %170, %171, %168 : vector<1x384xi1>, vector<1x384xf32>
    %c4_i32_40 = arith.constant 4 : i32
    %173 = vector.broadcast %c4_i32_40 : i32 to vector<1x384xi32>
    %174 = arith.cmpi eq, %155, %173 : vector<1x384xi32>
    %175 = vector.broadcast %22 : f32 to vector<1x384xf32>
    %176 = arith.select %174, %175, %172 : vector<1x384xi1>, vector<1x384xf32>
    %c5_i32_41 = arith.constant 5 : i32
    %177 = vector.broadcast %c5_i32_41 : i32 to vector<1x384xi32>
    %178 = arith.cmpi eq, %155, %177 : vector<1x384xi32>
    %179 = vector.broadcast %23 : f32 to vector<1x384xf32>
    %180 = arith.select %178, %179, %176 : vector<1x384xi1>, vector<1x384xf32>
    %c6_i32_42 = arith.constant 6 : i32
    %181 = vector.broadcast %c6_i32_42 : i32 to vector<1x384xi32>
    %182 = arith.cmpi eq, %155, %181 : vector<1x384xi32>
    %183 = vector.broadcast %24 : f32 to vector<1x384xf32>
    %184 = arith.select %182, %183, %180 : vector<1x384xi1>, vector<1x384xf32>
    %c7_i32_43 = arith.constant 7 : i32
    %185 = vector.broadcast %c7_i32_43 : i32 to vector<1x384xi32>
    %186 = arith.cmpi eq, %155, %185 : vector<1x384xi32>
    %187 = vector.broadcast %25 : f32 to vector<1x384xf32>
    %188 = arith.select %186, %187, %184 : vector<1x384xi1>, vector<1x384xf32>
    %c8_i32_44 = arith.constant 8 : i32
    %189 = vector.broadcast %c8_i32_44 : i32 to vector<1x384xi32>
    %190 = arith.cmpi eq, %155, %189 : vector<1x384xi32>
    %191 = vector.broadcast %26 : f32 to vector<1x384xf32>
    %192 = arith.select %190, %191, %188 : vector<1x384xi1>, vector<1x384xf32>
    %cst_45 = arith.constant 0.000000e+00 : f32
    %193 = vector.broadcast %cst_45 : f32 to vector<1x384xf32>
    %194 = arith.select %152, %192, %193 : vector<1x384xi1>, vector<1x384xf32>
    %195 = vector.broadcast %194 : vector<1x384xf32> to vector<8x384xf32>
    %196 = arith.mulf %195, %145 : vector<8x384xf32>
    %197 = arith.addf %143, %196 : vector<8x384xf32>
    %c382_i32 = arith.constant 382 : i32
    %198 = tpu.dynamic_rotate %1 by %c382_i32 dim 1 : vector<1x384xi32>, i32 -> vector<1x384xi32>
    %c382_i32_46 = arith.constant 382 : i32
    %199 = tpu.dynamic_rotate %0 by %c382_i32_46 dim 1 : vector<8x384xf32>, i32 -> vector<8x384xf32>
    %200 = arith.subi %198, %1 : vector<1x384xi32>
    %201 = arith.addi %17, %200 : vector<1x384xi32>
    %c0_i32_47 = arith.constant 0 : i32
    %202 = vector.broadcast %c0_i32_47 : i32 to vector<1x384xi32>
    %203 = arith.cmpi sge, %201, %202 : vector<1x384xi32>
    %c2_i32_48 = arith.constant 2 : i32
    %204 = vector.broadcast %c2_i32_48 : i32 to vector<1x384xi32>
    %205 = arith.cmpi sle, %201, %204 : vector<1x384xi32>
    %206 = arith.andi %203, %205 : vector<1x384xi1>
    %c3_i32_49 = arith.constant 3 : i32
    %207 = vector.broadcast %c3_i32_49 : i32 to vector<1x384xi32>
    %208 = arith.muli %207, %17 : vector<1x384xi32>
    %209 = arith.addi %208, %201 : vector<1x384xi32>
    %cst_50 = arith.constant 0.000000e+00 : f32
    %210 = vector.broadcast %cst_50 : f32 to vector<1x384xf32>
    %c0_i32_51 = arith.constant 0 : i32
    %211 = vector.broadcast %c0_i32_51 : i32 to vector<1x384xi32>
    %212 = arith.cmpi eq, %209, %211 : vector<1x384xi32>
    %213 = vector.broadcast %18 : f32 to vector<1x384xf32>
    %214 = arith.select %212, %213, %210 : vector<1x384xi1>, vector<1x384xf32>
    %c1_i32_52 = arith.constant 1 : i32
    %215 = vector.broadcast %c1_i32_52 : i32 to vector<1x384xi32>
    %216 = arith.cmpi eq, %209, %215 : vector<1x384xi32>
    %217 = vector.broadcast %19 : f32 to vector<1x384xf32>
    %218 = arith.select %216, %217, %214 : vector<1x384xi1>, vector<1x384xf32>
    %c2_i32_53 = arith.constant 2 : i32
    %219 = vector.broadcast %c2_i32_53 : i32 to vector<1x384xi32>
    %220 = arith.cmpi eq, %209, %219 : vector<1x384xi32>
    %221 = vector.broadcast %20 : f32 to vector<1x384xf32>
    %222 = arith.select %220, %221, %218 : vector<1x384xi1>, vector<1x384xf32>
    %c3_i32_54 = arith.constant 3 : i32
    %223 = vector.broadcast %c3_i32_54 : i32 to vector<1x384xi32>
    %224 = arith.cmpi eq, %209, %223 : vector<1x384xi32>
    %225 = vector.broadcast %21 : f32 to vector<1x384xf32>
    %226 = arith.select %224, %225, %222 : vector<1x384xi1>, vector<1x384xf32>
    %c4_i32_55 = arith.constant 4 : i32
    %227 = vector.broadcast %c4_i32_55 : i32 to vector<1x384xi32>
    %228 = arith.cmpi eq, %209, %227 : vector<1x384xi32>
    %229 = vector.broadcast %22 : f32 to vector<1x384xf32>
    %230 = arith.select %228, %229, %226 : vector<1x384xi1>, vector<1x384xf32>
    %c5_i32_56 = arith.constant 5 : i32
    %231 = vector.broadcast %c5_i32_56 : i32 to vector<1x384xi32>
    %232 = arith.cmpi eq, %209, %231 : vector<1x384xi32>
    %233 = vector.broadcast %23 : f32 to vector<1x384xf32>
    %234 = arith.select %232, %233, %230 : vector<1x384xi1>, vector<1x384xf32>
    %c6_i32_57 = arith.constant 6 : i32
    %235 = vector.broadcast %c6_i32_57 : i32 to vector<1x384xi32>
    %236 = arith.cmpi eq, %209, %235 : vector<1x384xi32>
    %237 = vector.broadcast %24 : f32 to vector<1x384xf32>
    %238 = arith.select %236, %237, %234 : vector<1x384xi1>, vector<1x384xf32>
    %c7_i32_58 = arith.constant 7 : i32
    %239 = vector.broadcast %c7_i32_58 : i32 to vector<1x384xi32>
    %240 = arith.cmpi eq, %209, %239 : vector<1x384xi32>
    %241 = vector.broadcast %25 : f32 to vector<1x384xf32>
    %242 = arith.select %240, %241, %238 : vector<1x384xi1>, vector<1x384xf32>
    %c8_i32_59 = arith.constant 8 : i32
    %243 = vector.broadcast %c8_i32_59 : i32 to vector<1x384xi32>
    %244 = arith.cmpi eq, %209, %243 : vector<1x384xi32>
    %245 = vector.broadcast %26 : f32 to vector<1x384xf32>
    %246 = arith.select %244, %245, %242 : vector<1x384xi1>, vector<1x384xf32>
    %cst_60 = arith.constant 0.000000e+00 : f32
    %247 = vector.broadcast %cst_60 : f32 to vector<1x384xf32>
    %248 = arith.select %206, %246, %247 : vector<1x384xi1>, vector<1x384xf32>
    %249 = vector.broadcast %248 : vector<1x384xf32> to vector<8x384xf32>
    %250 = arith.mulf %249, %199 : vector<8x384xf32>
    %251 = arith.addf %197, %250 : vector<8x384xf32>
    %c383_i32 = arith.constant 383 : i32
    %252 = tpu.dynamic_rotate %1 by %c383_i32 dim 1 : vector<1x384xi32>, i32 -> vector<1x384xi32>
    %c383_i32_61 = arith.constant 383 : i32
    %253 = tpu.dynamic_rotate %0 by %c383_i32_61 dim 1 : vector<8x384xf32>, i32 -> vector<8x384xf32>
    %254 = arith.subi %252, %1 : vector<1x384xi32>
    %255 = arith.addi %17, %254 : vector<1x384xi32>
    %c0_i32_62 = arith.constant 0 : i32
    %256 = vector.broadcast %c0_i32_62 : i32 to vector<1x384xi32>
    %257 = arith.cmpi sge, %255, %256 : vector<1x384xi32>
    %c2_i32_63 = arith.constant 2 : i32
    %258 = vector.broadcast %c2_i32_63 : i32 to vector<1x384xi32>
    %259 = arith.cmpi sle, %255, %258 : vector<1x384xi32>
    %260 = arith.andi %257, %259 : vector<1x384xi1>
    %c3_i32_64 = arith.constant 3 : i32
    %261 = vector.broadcast %c3_i32_64 : i32 to vector<1x384xi32>
    %262 = arith.muli %261, %17 : vector<1x384xi32>
    %263 = arith.addi %262, %255 : vector<1x384xi32>
    %cst_65 = arith.constant 0.000000e+00 : f32
    %264 = vector.broadcast %cst_65 : f32 to vector<1x384xf32>
    %c0_i32_66 = arith.constant 0 : i32
    %265 = vector.broadcast %c0_i32_66 : i32 to vector<1x384xi32>
    %266 = arith.cmpi eq, %263, %265 : vector<1x384xi32>
    %267 = vector.broadcast %18 : f32 to vector<1x384xf32>
    %268 = arith.select %266, %267, %264 : vector<1x384xi1>, vector<1x384xf32>
    %c1_i32_67 = arith.constant 1 : i32
    %269 = vector.broadcast %c1_i32_67 : i32 to vector<1x384xi32>
    %270 = arith.cmpi eq, %263, %269 : vector<1x384xi32>
    %271 = vector.broadcast %19 : f32 to vector<1x384xf32>
    %272 = arith.select %270, %271, %268 : vector<1x384xi1>, vector<1x384xf32>
    %c2_i32_68 = arith.constant 2 : i32
    %273 = vector.broadcast %c2_i32_68 : i32 to vector<1x384xi32>
    %274 = arith.cmpi eq, %263, %273 : vector<1x384xi32>
    %275 = vector.broadcast %20 : f32 to vector<1x384xf32>
    %276 = arith.select %274, %275, %272 : vector<1x384xi1>, vector<1x384xf32>
    %c3_i32_69 = arith.constant 3 : i32
    %277 = vector.broadcast %c3_i32_69 : i32 to vector<1x384xi32>
    %278 = arith.cmpi eq, %263, %277 : vector<1x384xi32>
    %279 = vector.broadcast %21 : f32 to vector<1x384xf32>
    %280 = arith.select %278, %279, %276 : vector<1x384xi1>, vector<1x384xf32>
    %c4_i32_70 = arith.constant 4 : i32
    %281 = vector.broadcast %c4_i32_70 : i32 to vector<1x384xi32>
    %282 = arith.cmpi eq, %263, %281 : vector<1x384xi32>
    %283 = vector.broadcast %22 : f32 to vector<1x384xf32>
    %284 = arith.select %282, %283, %280 : vector<1x384xi1>, vector<1x384xf32>
    %c5_i32_71 = arith.constant 5 : i32
    %285 = vector.broadcast %c5_i32_71 : i32 to vector<1x384xi32>
    %286 = arith.cmpi eq, %263, %285 : vector<1x384xi32>
    %287 = vector.broadcast %23 : f32 to vector<1x384xf32>
    %288 = arith.select %286, %287, %284 : vector<1x384xi1>, vector<1x384xf32>
    %c6_i32_72 = arith.constant 6 : i32
    %289 = vector.broadcast %c6_i32_72 : i32 to vector<1x384xi32>
    %290 = arith.cmpi eq, %263, %289 : vector<1x384xi32>
    %291 = vector.broadcast %24 : f32 to vector<1x384xf32>
    %292 = arith.select %290, %291, %288 : vector<1x384xi1>, vector<1x384xf32>
    %c7_i32_73 = arith.constant 7 : i32
    %293 = vector.broadcast %c7_i32_73 : i32 to vector<1x384xi32>
    %294 = arith.cmpi eq, %263, %293 : vector<1x384xi32>
    %295 = vector.broadcast %25 : f32 to vector<1x384xf32>
    %296 = arith.select %294, %295, %292 : vector<1x384xi1>, vector<1x384xf32>
    %c8_i32_74 = arith.constant 8 : i32
    %297 = vector.broadcast %c8_i32_74 : i32 to vector<1x384xi32>
    %298 = arith.cmpi eq, %263, %297 : vector<1x384xi32>
    %299 = vector.broadcast %26 : f32 to vector<1x384xf32>
    %300 = arith.select %298, %299, %296 : vector<1x384xi1>, vector<1x384xf32>
    %cst_75 = arith.constant 0.000000e+00 : f32
    %301 = vector.broadcast %cst_75 : f32 to vector<1x384xf32>
    %302 = arith.select %260, %300, %301 : vector<1x384xi1>, vector<1x384xf32>
    %303 = vector.broadcast %302 : vector<1x384xf32> to vector<8x384xf32>
    %304 = arith.mulf %303, %253 : vector<8x384xf32>
    %305 = arith.addf %251, %304 : vector<8x384xf32>
    %306 = vector.broadcast %38 : vector<1x384xf32> to vector<8x384xf32>
    %307 = arith.addf %305, %306 : vector<8x384xf32>
    %c0_76 = arith.constant 0 : index
    %c0_77 = arith.constant 0 : index
    %308 = vector.load %arg3[%c0_76, %c0_77] : memref<8x384xf32, #tpu.memory_space<vmem>>, vector<8x384xf32>
    tpu.vector_store %arg3[%c0_76, %c0_77], %307 {strides = array<i32>} : memref<8x384xf32, #tpu.memory_space<vmem>>, vector<8x384xf32>,
    return
  }
  func.func @transform_0(%arg0: i32) -> i32 {
    %c0_i32 = arith.constant 0 : i32
    %c0_i32_0 = arith.constant 0 : i32
    return %c0_i32 : i32
  }
  func.func @transform_1(%arg0: i32) -> (i32, i32) {
    %c0_i32 = arith.constant 0 : i32
    %c0_i32_0 = arith.constant 0 : i32
    return %arg0, %c0_i32 : i32, i32
  }
  func.func @transform_2(%arg0: i32) -> (i32, i32) {
    %c0_i32 = arith.constant 0 : i32
    %c0_i32_0 = arith.constant 0 : i32
    return %arg0, %c0_i32 : i32, i32
  }
}

</mosaic_0001>

<bundles_post_ra>
// kernel: transform_layer_forward.1
= control target key start
LH: loop header
LB: loop body
LE: loop exit
PB: predicated region body
PF: predicated region fallthrough
CT: control target
= control target key end

     0   :  { %7 = vsyncpa [#allocation3], 0  ;;  %s1471_s0 = inlined_call_operand.vmem [shape: f32[12], index: 0, kind: input, shape index: {}]   ;;  %s1472_s1 = inlined_call_operand.vmem [shape: f32[8,384], index: 1, kind: input, shape index: {}]   ;;  %s1473_s2 = inlined_call_operand.vmem [shape: f32[8,384], index: 2, kind: output, shape index: {}]  }
   0x1   :  { %s14_s11 = sshll.u32 %s1471_s0, 4  ;;  %s15_s11 = int_to_ptr.vmem [resolvable:$true] %s14_s11 }
   0x2   :  { %s671_s12 = scalar_lea.vmem %s15_s11, 16  ;;  %p676_p1 = scmp.lt.s32.totalorder %s15_s11, %s15_s11 }
   0x3   :  { %p672_p0 = scmp.ne.s32.totalorder %s15_s11, %s671_s12  ;;  %p677_p2 = scmp.lt.s32.totalorder %s671_s12, %s671_s12 }
   0x5   :  { %p678_p3 = por %p677_p2, %p676_p1 }
   0x7   :  { %p679_p4 = pnand %p678_p3, %p672_p0 }
   0x9   :  { %682 = shalt.err (!%p679_p4)
}
   0xa   :  { %s685_s13 = smov [#allocation2]  }
   0xb   :  { %17 = dma.vmem_to_smem %s15_s11, 16, %s685_s13, [#allocation3]  }
   0xc   :  { %683 = dma.done.wait [#allocation3], 16  }
   0xd   :  { %684 = vsyncadd [#allocation3], 4294967280 }
   0xe   :  { %23 = sfence }
   0xf   :  { %v27_v0 = vlaneseq  ;;  %s686_s14 = smov 2   ;;  %s687_s0 = smov 1   ;;  %v732_v4 = vld [vmem:[%s1472_s1 + $0x8] sm:$0xff]  ;;  %v737_v5 = vld [vmem:[%s1472_s1] sm:$0xff]  ;;  %v744_v6 = vld [vmem:[%s1472_s1 + $0x10] sm:$0xff] }
  0x10   :  { %s688_s15 = smov 126   ;;  %s689_s16 = smov 127  }
  0x11   :  { %v709_v1 = vand.u32 127, %v27_v0  ;;  %s79_s1 = sld [smem:[#allocation2]]  ;;  %s649_s23 = sld [smem:[#allocation2 + $0x1]] }
  0x12   :  { %s650_s24 = sld [smem:[#allocation2 + $0x2]]  ;;  %s651_s25 = sld [smem:[#allocation2 + $0x3]] }
  0x13   :  { %302 = vrot.lane.b32.xlu1 %v709_v1, %s686_s14  ;;  %190 = vrot.lane.b32.xlu0 %v709_v1, %s687_s0  ;;  %v714_v2 = vadd.s32 256, %v709_v1  ;;  %v717_v3 = vadd.s32 128, %v709_v1  ;;  %v757_v7 = vmul.u32.u64.low 2863311531, %v709_v1  ;;  %v758_v8 = vmul.u32.u64.high 2863311531, %v709_v1, %v757_v7  ;;  %s652_s26 = sld [smem:[#allocation2 + $0x4]]  ;;  %s653_s27 = sld [smem:[#allocation2 + $0x5]] }
  0x14   :  { %s654_s28 = sld [smem:[#allocation2 + $0x6]]  ;;  %s655_s29 = sld [smem:[#allocation2 + $0x7]] }
  0x15   :  { %v761_v9 = vmul.u32.u64.low 2863311531, %v717_v3  ;;  %v762_v10 = vmul.u32.u64.high 2863311531, %v717_v3, %v761_v9  ;;  %v765_v11 = vmul.u32.u64.low 2863311531, %v714_v2  ;;  %v766_v12 = vmul.u32.u64.high 2863311531, %v714_v2, %v765_v11  ;;  %s846_s30 = sld [smem:[#allocation2 + $0x8]]  ;;  %s856_s3 = sld [smem:[#allocation2 + $0xa]] }
  0x16   :  { %v37_v13 = vshrl.u32 %v758_v8, 1  ;;  %s862_s4 = sld [smem:[#allocation2 + $0xb]]  ;;  %s876_s5 = sld [smem:[#allocation2 + $0x9]] }
  0x17   :  { %194 = vrot.lane.b32.xlu1 %v714_v2, %s687_s0  ;;  %192 = vrot.lane.b32.xlu0 %v717_v3, %s687_s0  ;;  %v48_v14 = vshrl.u32 %v762_v10, 1  ;;  %v59_v15 = vshrl.u32 %v766_v12, 1  ;;  %v804_v34 = vstv %s79_s1  ;;  %v812_v38 = vstv %s649_s23 }
  0x18   :  { %v38_v16 = vmul.u32 3, %v37_v13  ;;  %v820_v42 = vstv %s650_s24  ;;  %v828_v46 = vstv %s651_s25 }
  0x19   :  { %v49_v17 = vmul.u32 3, %v48_v14  ;;  %v60_v18 = vmul.u32 3, %v59_v15  ;;  %v836_v50 = vstv %s652_s26  ;;  %v844_v54 = vstv %s653_s27 }
  0x1a   :  { %v39_v19 = vsub.s32 %v709_v1, %v38_v16  ;;  %v854_v58 = vstv %s654_s28  ;;  %v860_v60 = vstv %s655_s29 }
  0x1b   :  { %306 = vrot.lane.b32.xlu1 %v714_v2, %s686_s14  ;;  %304 = vrot.lane.b32.xlu0 %v717_v3, %s686_s14  ;;  %v50_v20 = vsub.s32 %v717_v3, %v49_v17  ;;  %v61_v21 = vsub.s32 %v714_v2, %v60_v18  ;;  %v884_v11 = vstv %s846_s30 }
  0x1c   :  { %vm64_vm0 = vcmp.ne.s32.totalorder %v39_v19, 0  ;;  %vm67_vm1 = vcmp.lt.s32.totalorder %v39_v19, 0  ;;  %v73_v23 = vadd.s32 3, %v39_v19 }
  0x1d   :  { %vm65_vm2 = vcmp.ne.s32.totalorder %v50_v20, 0  ;;  %vm68_vm3 = vcmp.lt.s32.totalorder %v50_v20, 0  ;;  %vm66_vm4 = vcmp.ne.s32.totalorder %v61_v21, 0  ;;  %vm69_vm5 = vcmp.lt.s32.totalorder %v61_v21, 0  ;;  %vm70_vm6 = vmand %vm67_vm1, %vm64_vm0 }
  0x1e   :  { %v74_v22 = vadd.s32 3, %v50_v20  ;;  %v75_v24 = vadd.s32 3, %v61_v21  ;;  %vm71_vm7 = vmand %vm68_vm3, %vm65_vm2  ;;  %v776_v26 = vsel %vm70_vm6, %v73_v23, %v39_v19 }
  0x1f   :  { %416 = vrot.lane.b32.xlu1 %v717_v3, %s688_s15  ;;  %414 = vrot.lane.b32.xlu0 %v709_v1, %s688_s15  ;;  %vm72_vm8 = vmand %vm69_vm5, %vm66_vm4  ;;  %v784_v29 = vmul.u32 3, %v776_v26 }
  0x20   :  { %v774_v25 = vsel %vm71_vm7, %v74_v22, %v50_v20  ;;  %v778_v27 = vsel %vm72_vm8, %v75_v24, %v61_v21  ;;  %v913_v20 = vstv %s856_s3  ;;  %v922_v24 = vstv %s862_s4 }
  0x21   :  { %v781_v28 = vmul.u32 3, %v774_v25  ;;  %v787_v30 = vmul.u32 3, %v778_v27  ;;  %v795_v32 = vadd.s32 %v784_v29, %v776_v26 }
  0x23   :  { %526 = vrot.lane.b32.xlu1 %v709_v1, %s689_s16  ;;  %418 = vrot.lane.b32.xlu0 %v714_v2, %s688_s15  ;;  %v791_v31 = vadd.s32 %v781_v28, %v774_v25  ;;  %v799_v33 = vadd.s32 %v787_v30, %v778_v27  ;;  %vm121_vm10 = vcmp.eq.s32.totalorder %v795_v32, 0  ;;  %vm128_vm13 = vcmp.eq.s32.totalorder %v795_v32, 1 }
  0x24   :  { %v125_v36 = vsel %vm121_vm10, %v804_v34, 0.0  ;;  %vm135_vm0 = vcmp.eq.s32.totalorder %v795_v32, 2  ;;  %vm142_vm3 = vcmp.eq.s32.totalorder %v795_v32, 3  ;;  %vm149_vm6 = vcmp.eq.s32.totalorder %v795_v32, 4 }
  0x25   :  { %vm122_vm9 = vcmp.eq.s32.totalorder %v791_v31, 0  ;;  %vm123_vm11 = vcmp.eq.s32.totalorder %v799_v33, 0  ;;  %vm129_vm12 = vcmp.eq.s32.totalorder %v791_v31, 1  ;;  %vm130_vm14 = vcmp.eq.s32.totalorder %v799_v33, 1 }
  0x26   :  { %v126_v35 = vsel %vm122_vm9, %v804_v34, 0.0  ;;  %v127_v37 = vsel %vm123_vm11, %v804_v34, 0.0  ;;  %vm136_vm15 = vcmp.eq.s32.totalorder %v791_v31, 2  ;;  %v132_v40 = vsel %vm128_vm13, %v812_v38, %v125_v36 }
  0x27   :  { %530 = vrot.lane.b32.xlu1 %v714_v2, %s689_s16  ;;  %528 = vrot.lane.b32.xlu0 %v717_v3, %s689_s16  ;;  %v133_v39 = vsel %vm129_vm12, %v812_v38, %v126_v35  ;;  %v134_v41 = vsel %vm130_vm14, %v812_v38, %v127_v37  ;;  %vm137_vm1 = vcmp.eq.s32.totalorder %v799_v33, 2  ;;  %vm143_vm2 = vcmp.eq.s32.totalorder %v791_v31, 3 }
  0x28   :  { %v140_v43 = vsel %vm136_vm15, %v820_v42, %v133_v39  ;;  %v139_v44 = vsel %vm135_vm0, %v820_v42, %v132_v40  ;;  %v141_v45 = vsel %vm137_vm1, %v820_v42, %v134_v41  ;;  %vm144_vm4 = vcmp.eq.s32.totalorder %v799_v33, 3 }
  0x29   :  { %v147_v47 = vsel %vm143_vm2, %v828_v46, %v140_v43  ;;  %vm150_vm5 = vcmp.eq.s32.totalorder %v791_v31, 4  ;;  %v146_v48 = vsel %vm142_vm3, %v828_v46, %v139_v44  ;;  %v148_v49 = vsel %vm144_vm4, %v828_v46, %v141_v45 }
  0x2a   :  { %vm151_vm7 = vcmp.eq.s32.totalorder %v799_v33, 4  ;;  %v154_v51 = vsel %vm150_vm5, %v836_v50, %v147_v47  ;;  %vm157_vm8 = vcmp.eq.s32.totalorder %v791_v31, 5  ;;  %v153_v52 = vsel %vm149_vm6, %v836_v50, %v146_v48 }
  0x2b   :  { %202 = vrot.lane.b32.xlu1 %v732_v4, %s687_s0  ;;  %200 = vrot.lane.b32.xlu0 %v737_v5, %s687_s0  ;;  %v155_v53 = vsel %vm151_vm7, %v836_v50, %v148_v49  ;;  %vm156_vm9 = vcmp.eq.s32.totalorder %v795_v32, 5  ;;  %vm158_vm10 = vcmp.eq.s32.totalorder %v799_v33, 5  ;;  %v161_v55 = vsel %vm157_vm8, %v844_v54, %v154_v51 }
  0x2c   :  { %vm164_vm11 = vcmp.eq.s32.totalorder %v791_v31, 6  ;;  %v160_v56 = vsel %vm156_vm9, %v844_v54, %v153_v52  ;;  %v162_v57 = vsel %vm158_vm10, %v844_v54, %v155_v53  ;;  %vm163_vm12 = vcmp.eq.s32.totalorder %v795_v32, 6 }
  0x2d   :  { %vm165_vm13 = vcmp.eq.s32.totalorder %v799_v33, 6  ;;  %v168_v59 = vsel %vm164_vm11, %v854_v58, %v161_v55  ;;  %vm171_vm14 = vcmp.eq.s32.totalorder %v791_v31, 7  ;;  %v167_v61 = vsel %vm163_vm12, %v854_v58, %v160_v56 }
  0x2e   :  { %v169_v62 = vsel %vm165_vm13, %v854_v58, %v162_v57  ;;  %vm170_vm15 = vcmp.eq.s32.totalorder %v795_v32, 7  ;;  %vm172_vm0 = vcmp.eq.s32.totalorder %v799_v33, 7  ;;  %vm107_vm1 = vcmp.ge.s32.totalorder %v774_v25, 0 }
  0x2f   :  { %312 = vrot.lane.b32.xlu1 %v737_v5, %s686_s14  ;;  %204 = vrot.lane.b32.xlu0 %v744_v6, %s687_s0  ;;  %vm106_vm2 = vcmp.ge.s32.totalorder %v776_v26, 0  ;;  %vm108_vm3 = vcmp.ge.s32.totalorder %v778_v27, 0  ;;  %vm109_vm4 = vcmp.le.s32.totalorder %v776_v26, 2  ;;  %vm110_vm5 = vcmp.le.s32.totalorder %v774_v25, 2 }
  0x30   :  { %v175_v8 = vsel %vm171_vm14, %v860_v60, %v168_v59  ;;  %vm178_vm6 = vcmp.eq.s32.totalorder %v791_v31, 8  ;;  %vm111_vm7 = vcmp.le.s32.totalorder %v778_v27, 2  ;;  %v174_v9 = vsel %vm170_vm15, %v860_v60, %v167_v61  ;;  %vm888_vm11 = vmand %vm106_vm2, %vm109_vm4 }
  0x31   :  { %v176_v10 = vsel %vm172_vm0, %v860_v60, %v169_v62  ;;  %vm177_vm8 = vcmp.eq.s32.totalorder %v795_v32, 8  ;;  %vm179_vm9 = vcmp.eq.s32.totalorder %v799_v33, 8  ;;  %vm196_vm10 = vcmp.lt.s32.totalorder %v709_v1, 1  ;;  %vm896_vm14 = vmand %vm107_vm1, %vm110_vm5 }
  0x32   :  { %vm308_vm12 = vcmp.lt.s32.totalorder %v709_v1, 2  ;;  %vm420_vm13 = vcmp.lt.s32.totalorder %v709_v1, 126  ;;  %v182_v14 = vsel %vm178_vm6, %v884_v11, %v175_v8  ;;  %vm905_vm15 = vmand %vm108_vm3, %vm111_vm7  ;;  %v181_v18 = vsel %vm177_vm8, %v884_v11, %v174_v9 }
  0x33   :  { %316 = vrot.lane.b32.xlu1 %v744_v6, %s686_s14  ;;  %314 = vrot.lane.b32.xlu0 %v732_v4, %s686_s14  ;;  %v183_v19 = vsel %vm179_vm9, %v884_v11, %v176_v10  ;;  %vm96_vm0 = vcmp.eq.s32.totalorder %v778_v27, 1  ;;  %v285_v35 = vshrl.u32 %v27_v0, 7  ;;  %v185_v36 = vsel %vm896_vm14, %v182_v14, 0.0 }
  0x34   :  { %v184_v37 = vsel %vm888_vm11, %v181_v18, 0.0  ;;  %v186_v39 = vsel %vm905_vm15, %v183_v19, 0.0  ;;  %vm93_vm1 = vcmp.eq.s32.totalorder %v778_v27, 0  ;;  %v101_v0 = vsel %vm96_vm0, %v913_v20, %v922_v24 }
  0x35   :  { %v946_v45 = vstv %s876_s5  ;;  %vm532_vm2 = vcmp.lt.s32.totalorder %v709_v1, 127  ;;  %v961_v53 = vmul.f32 %v185_v36, %v732_v4  ;;  %v963_v55 = vsub.s32 0, %v285_v35 }
  0x36   :  { %v968_v59 = vmul.f32 %v186_v39, %v744_v6  ;;  %v971_v61 = vmul.f32 %v184_v37, %v737_v5 }
  0x37   :  { %426 = vrot.lane.b32.xlu1 %v732_v4, %s688_s15  ;;  %424 = vrot.lane.b32.xlu0 %v737_v5, %s688_s15 }
  0x3b   :  { %536 = vrot.lane.b32.xlu1 %v737_v5, %s689_s16  ;;  %428 = vrot.lane.b32.xlu0 %v744_v6, %s688_s15 }
  0x3f   :  { %540 = vrot.lane.b32.xlu1 %v744_v6, %s689_s16  ;;  %538 = vrot.lane.b32.xlu0 %v732_v4, %s689_s16  ;;  %v977_v4 = vsel %vm93_vm1, %v946_v45, %v101_v0 }
  0x85   :  { %v303_v63 = vpop.permute.xlu1 %302  ;;  %v191_v7 = vpop.permute.xlu0 %190 }
  0x89   :  { %v195_v15 = vpop.permute.xlu1 %194  ;;  %v193_v16 = vpop.permute.xlu0 %192 }
  0x8a   :  { %v199_v21 = vsel %vm196_vm10, %v195_v15, %v191_v7  ;;  %v197_v22 = vsel %vm196_vm10, %v193_v16, %v195_v15  ;;  %v198_v23 = vsel %vm196_vm10, %v191_v7, %v193_v16 }
  0x8b   :  { %v209_v31 = vsub.s32 %v199_v21, %v709_v1  ;;  %v210_v32 = vsub.s32 %v198_v23, %v717_v3  ;;  %v211_v33 = vsub.s32 %v197_v22, %v714_v2 }
  0x8d   :  { %v936_v40 = vadd.s32 %v209_v31, %v776_v26  ;;  %v939_v41 = vadd.s32 %v210_v32, %v774_v25  ;;  %v307_v43 = vpop.permute.xlu1 %306  ;;  %v305_v44 = vpop.permute.xlu0 %304  ;;  %v949_v47 = vadd.s32 %v211_v33, %v778_v27 }
  0x8e   :  { %v311_v48 = vsel %vm308_vm12, %v307_v43, %v303_v63  ;;  %v309_v49 = vsel %vm308_vm12, %v305_v44, %v307_v43  ;;  %v310_v51 = vsel %vm308_vm12, %v303_v63, %v305_v44 }
  0x8f   :  { %v225_v52 = vadd.s32 %v939_v41, %v781_v28  ;;  %v321_v56 = vsub.s32 %v311_v48, %v709_v1  ;;  %v322_v57 = vsub.s32 %v310_v51, %v717_v3  ;;  %v323_v62 = vsub.s32 %v309_v49, %v714_v2 }
  0x90   :  { %v981_v8 = vadd.s32 %v936_v40, %v784_v29  ;;  %v985_v6 = vadd.s32 %v949_v47, %v787_v30  ;;  %vm216_vm5 = vcmp.ge.s32.totalorder %v939_v41, 0  ;;  %vm219_vm14 = vcmp.le.s32.totalorder %v939_v41, 2 }
  0x91   :  { %v417_v63 = vpop.permute.xlu1 %416  ;;  %v415_v7 = vpop.permute.xlu0 %414  ;;  %vm228_vm3 = vcmp.eq.s32.totalorder %v225_v52, 0  ;;  %vm234_vm4 = vcmp.eq.s32.totalorder %v225_v52, 1  ;;  %vm240_vm6 = vcmp.eq.s32.totalorder %v225_v52, 2  ;;  %v994_v13 = vadd.s32 %v321_v56, %v776_v26  ;;  %vm222_vm1 = vmand %vm216_vm5, %vm219_vm14 }
  0x92   :  { %v422_v5 = vsel %vm420_vm13, %v415_v7, %v417_v63  ;;  %v231_v9 = vsel %vm228_vm3, %v804_v34, 0.0  ;;  %v997_v14 = vadd.s32 %v322_v57, %v774_v25  ;;  %vm246_vm7 = vcmp.eq.s32.totalorder %v225_v52, 3 }
  0x93   :  { %v433_v10 = vsub.s32 %v422_v5, %v709_v1  ;;  %v237_v12 = vsel %vm234_vm4, %v812_v38, %v231_v9  ;;  %v1001_v16 = vadd.s32 %v323_v62, %v778_v27  ;;  %vm252_vm8 = vcmp.eq.s32.totalorder %v225_v52, 4 }
  0x94   :  { %v243_v15 = vsel %vm240_vm6, %v820_v42, %v237_v12  ;;  %vm258_vm9 = vcmp.eq.s32.totalorder %v225_v52, 5  ;;  %vm264_vm11 = vcmp.eq.s32.totalorder %v225_v52, 6  ;;  %v1017_v36 = vadd.s32 %v994_v13, %v784_v29 }
  0x95   :  { %v1004_v17 = vadd.s32 %v433_v10, %v776_v26  ;;  %v527_v18 = vpop.permute.xlu1 %526  ;;  %v419_v19 = vpop.permute.xlu0 %418  ;;  %v249_v21 = vsel %vm246_vm7, %v828_v46, %v243_v15  ;;  %vm270_vm15 = vcmp.eq.s32.totalorder %v225_v52, 7  ;;  %vm276_vm0 = vcmp.eq.s32.totalorder %v225_v52, 8 }
  0x96   :  { %v421_v22 = vsel %vm420_vm13, %v417_v63, %v419_v19  ;;  %v423_v23 = vsel %vm420_vm13, %v419_v19, %v415_v7  ;;  %v255_v31 = vsel %vm252_vm8, %v836_v50, %v249_v21  ;;  %v1030_v49 = vadd.s32 %v997_v14, %v781_v28 }
  0x97   :  { %v434_v32 = vsub.s32 %v421_v22, %v717_v3  ;;  %v435_v33 = vsub.s32 %v423_v23, %v714_v2  ;;  %v261_v35 = vsel %vm258_vm9, %v844_v54, %v255_v31  ;;  %v1039_v62 = vadd.s32 %v1001_v16, %v787_v30 }
  0x98   :  { %v267_v37 = vsel %vm264_vm11, %v854_v58, %v261_v35  ;;  %v1043_v63 = vadd.s32 %v1004_v17, %v784_v29  ;;  %vm215_vm3 = vcmp.ge.s32.totalorder %v936_v40, 0  ;;  %vm218_vm4 = vcmp.le.s32.totalorder %v936_v40, 2 }
  0x99   :  { %v1022_v39 = vadd.s32 %v434_v32, %v774_v25  ;;  %v1025_v43 = vadd.s32 %v435_v33, %v778_v27  ;;  %v531_v44 = vpop.permute.xlu1 %530  ;;  %v529_v0 = vpop.permute.xlu0 %528  ;;  %v273_v48 = vsel %vm270_vm15, %v860_v60, %v267_v37  ;;  %vm227_vm6 = vcmp.eq.s32.totalorder %v981_v8, 0 }
  0x9a   :  { %v535_v51 = vsel %vm532_vm2, %v531_v44, %v527_v18  ;;  %v534_v56 = vsel %vm532_vm2, %v527_v18, %v529_v0  ;;  %v279_v57 = vsel %vm276_vm0, %v884_v11, %v273_v48  ;;  %v533_v7 = vsel %vm532_vm2, %v529_v0, %v531_v44 }
  0x9b   :  { %v547_v52 = vsub.s32 %v535_v51, %v714_v2  ;;  %v545_v5 = vsub.s32 %v534_v56, %v709_v1  ;;  %v282_v9 = vsel %vm222_vm1, %v279_v57, 0.0  ;;  %v1058_v2 = vadd.s32 %v1022_v39, %v781_v28 }
  0x9c   :  { %v1062_v10 = vadd.s32 %v1025_v43, %v787_v30  ;;  %v291_v41 = vrot.slane %v282_v9, %v963_v55  ;;  %vm217_vm5 = vcmp.ge.s32.totalorder %v949_v47, 0  ;;  %vm229_vm7 = vcmp.eq.s32.totalorder %v985_v6, 0 }
  0x9d   :  { %v203_v12 = vpop.permute.xlu1 %202  ;;  %v201_v15 = vpop.permute.xlu0 %200  ;;  %v546_v18 = vsub.s32 %v533_v7, %v717_v3  ;;  %v230_v21 = vsel %vm227_vm6, %v804_v34, 0.0  ;;  %v232_v22 = vsel %vm229_vm7, %v804_v34, 0.0  ;;  %v1073_v23 = vadd.s32 %v547_v52, %v778_v27 }
  0x9e   :  { %v207_v19 = vsel %vm196_vm10, %v201_v15, %v203_v12  ;;  %vm220_vm8 = vcmp.le.s32.totalorder %v949_v47, 2  ;;  %vm233_vm9 = vcmp.eq.s32.totalorder %v981_v8, 1  ;;  %v1078_v32 = vadd.s32 %v545_v5, %v776_v26 }
  0x9f   :  { %v297_v31 = vmul.f32 %v291_v41, %v207_v19  ;;  %vm235_vm11 = vcmp.eq.s32.totalorder %v985_v6, 1  ;;  %v236_v3 = vsel %vm233_vm9, %v812_v38, %v230_v21  ;;  %vm239_vm14 = vcmp.eq.s32.totalorder %v981_v8, 2 }
  0xa0   :  { %v238_v27 = vsel %vm235_vm11, %v812_v38, %v232_v22  ;;  %vm241_vm15 = vcmp.eq.s32.totalorder %v985_v6, 2  ;;  %v242_v35 = vsel %vm239_vm14, %v820_v42, %v236_v3  ;;  %v1090_v37 = vadd.s32 %v546_v18, %v774_v25 }
  0xa1   :  { %v1084_v33 = vadd.f32 %v297_v31, %v961_v53  ;;  %v244_v44 = vsel %vm241_vm15, %v820_v42, %v238_v27  ;;  %vm245_vm0 = vcmp.eq.s32.totalorder %v981_v8, 3  ;;  %vm247_vm1 = vcmp.eq.s32.totalorder %v985_v6, 3  ;;  %v205_v52 = vpop.permute.xlu0 %204  ;;  %v1107_v7 = vpop.permute.xlu1 %312 }
  0xa2   :  { %v248_v0 = vsel %vm245_vm0, %v828_v46, %v242_v35  ;;  %v250_v53 = vsel %vm247_vm1, %v828_v46, %v244_v44  ;;  %vm251_vm6 = vcmp.eq.s32.totalorder %v981_v8, 4  ;;  %vm253_vm7 = vcmp.eq.s32.totalorder %v985_v6, 4 }
  0xa3   :  { %v254_v48 = vsel %vm251_vm6, %v836_v50, %v248_v0  ;;  %v256_v51 = vsel %vm253_vm7, %v836_v50, %v250_v53  ;;  %vm257_vm9 = vcmp.eq.s32.totalorder %v981_v8, 5  ;;  %vm259_vm11 = vcmp.eq.s32.totalorder %v985_v6, 5  ;;  %vm221_vm6 = vmand %vm215_vm3, %vm218_vm4 }
  0xa4   :  { %v260_v56 = vsel %vm257_vm9, %v844_v54, %v254_v48  ;;  %v262_v57 = vsel %vm259_vm11, %v844_v54, %v256_v51  ;;  %vm263_vm14 = vcmp.eq.s32.totalorder %v981_v8, 6  ;;  %vm265_vm15 = vcmp.eq.s32.totalorder %v985_v6, 6  ;;  %vm223_vm11 = vmand %vm217_vm5, %vm220_vm8 }
  0xa5   :  { %v266_v5 = vsel %vm263_vm14, %v854_v58, %v260_v56  ;;  %v268_v9 = vsel %vm265_vm15, %v854_v58, %v262_v57  ;;  %vm269_vm0 = vcmp.eq.s32.totalorder %v981_v8, 7  ;;  %vm271_vm1 = vcmp.eq.s32.totalorder %v985_v6, 7  ;;  %v1143_v44 = vpop.permute.xlu1 %316 }
  0xa6   :  { %v272_v41 = vsel %vm269_vm0, %v860_v60, %v266_v5  ;;  %v274_v18 = vsel %vm271_vm1, %v860_v60, %v268_v9  ;;  %vm275_vm7 = vcmp.eq.s32.totalorder %v981_v8, 8  ;;  %vm277_vm9 = vcmp.eq.s32.totalorder %v985_v6, 8 }
  0xa7   :  { %v278_v19 = vsel %vm275_vm7, %v884_v11, %v272_v41  ;;  %v280_v21 = vsel %vm277_vm9, %v884_v11, %v274_v18  ;;  %v206_v40 = vsel %vm196_vm10, %v203_v12, %v205_v52  ;;  %v208_v22 = vsel %vm196_vm10, %v205_v52, %v201_v15 }
  0xa8   :  { %v281_v31 = vsel %vm221_vm6, %v278_v19, 0.0  ;;  %v283_v3 = vsel %vm223_vm11, %v280_v21, 0.0  ;;  %vm327_vm3 = vcmp.ge.s32.totalorder %v994_v13, 0  ;;  %vm339_vm4 = vcmp.eq.s32.totalorder %v1017_v36, 0 }
  0xa9   :  { %v287_v8 = vrot.slane %v281_v31, %v963_v55  ;;  %v295_v47 = vrot.slane %v283_v3, %v963_v55  ;;  %v342_v6 = vsel %vm339_vm4, %v804_v34, 0.0  ;;  %vm345_vm5 = vcmp.eq.s32.totalorder %v1017_v36, 1 }
  0xaa   :  { %vm330_vm8 = vcmp.le.s32.totalorder %v994_v13, 2  ;;  %v348_v12 = vsel %vm345_vm5, %v812_v38, %v342_v6  ;;  %vm351_vm10 = vcmp.eq.s32.totalorder %v1017_v36, 2  ;;  %vm357_vm14 = vcmp.eq.s32.totalorder %v1017_v36, 3 }
  0xab   :  { %v296_v15 = vmul.f32 %v287_v8, %v208_v22  ;;  %v298_v27 = vmul.f32 %v295_v47, %v206_v40  ;;  %v354_v35 = vsel %vm351_vm10, %v820_v42, %v348_v12  ;;  %vm363_vm15 = vcmp.eq.s32.totalorder %v1017_v36, 4 }
  0xac   :  { %v360_v0 = vsel %vm357_vm14, %v828_v46, %v354_v35  ;;  %vm369_vm0 = vcmp.eq.s32.totalorder %v1017_v36, 5  ;;  %vm375_vm1 = vcmp.eq.s32.totalorder %v1017_v36, 6  ;;  %vm381_vm6 = vcmp.eq.s32.totalorder %v1017_v36, 7 }
  0xad   :  { %v299_v53 = vadd.f32 %v296_v15, %v971_v61  ;;  %v1151_v48 = vadd.f32 %v298_v27, %v968_v59  ;;  %v366_v51 = vsel %vm363_vm15, %v836_v50, %v360_v0  ;;  %vm387_vm7 = vcmp.eq.s32.totalorder %v1017_v36, 8  ;;  %v315_v27 = vpop.permute.xlu0 %314 }
  0xae   :  { %v372_v56 = vsel %vm369_vm0, %v844_v54, %v366_v51  ;;  %v320_v57 = vsel %vm308_vm12, %v1143_v44, %v1107_v7  ;;  %vm328_vm9 = vcmp.ge.s32.totalorder %v997_v14, 0  ;;  %vm331_vm11 = vcmp.le.s32.totalorder %v997_v14, 2  ;;  %vm333_vm0 = vmand %vm327_vm3, %vm330_vm8 }
  0xaf   :  { %v378_v61 = vsel %vm375_vm1, %v854_v58, %v372_v56  ;;  %vm329_vm4 = vcmp.ge.s32.totalorder %v1001_v16, 0  ;;  %vm332_vm5 = vcmp.le.s32.totalorder %v1001_v16, 2  ;;  %vm340_vm10 = vcmp.eq.s32.totalorder %v1030_v49, 0 }
  0xb0   :  { %vm341_vm14 = vcmp.eq.s32.totalorder %v1039_v62, 0  ;;  %v384_v59 = vsel %vm381_vm6, %v860_v60, %v378_v61  ;;  %v343_v52 = vsel %vm340_vm10, %v804_v34, 0.0  ;;  %vm346_vm15 = vcmp.eq.s32.totalorder %v1030_v49, 1 }
  0xb1   :  { %v344_v5 = vsel %vm341_vm14, %v804_v34, 0.0  ;;  %v390_v9 = vsel %vm387_vm7, %v884_v11, %v384_v59  ;;  %vm347_vm1 = vcmp.eq.s32.totalorder %v1039_v62, 1  ;;  %v349_v41 = vsel %vm346_vm15, %v812_v38, %v343_v52 }
  0xb2   :  { %vm352_vm6 = vcmp.eq.s32.totalorder %v1030_v49, 2  ;;  %v393_v18 = vsel %vm333_vm0, %v390_v9, 0.0  ;;  %v350_v19 = vsel %vm347_vm1, %v812_v38, %v344_v5  ;;  %vm353_vm10 = vcmp.eq.s32.totalorder %v1039_v62, 2  ;;  %v1243_v9 = vpop.permute.xlu1 %426 }
  0xb3   :  { %v355_v21 = vsel %vm352_vm6, %v820_v42, %v349_v41  ;;  %v399_v13 = vrot.slane %v393_v18, %v963_v55  ;;  %v356_v40 = vsel %vm353_vm10, %v820_v42, %v350_v19  ;;  %vm358_vm3 = vcmp.eq.s32.totalorder %v1030_v49, 3  ;;  %v1248_v41 = vpop.permute.xlu0 %424 }
  0xb4   :  { %vm359_vm8 = vcmp.eq.s32.totalorder %v1039_v62, 3  ;;  %v361_v36 = vsel %vm358_vm3, %v828_v46, %v355_v21  ;;  %vm364_vm7 = vcmp.eq.s32.totalorder %v1030_v49, 4  ;;  %vm365_vm14 = vcmp.eq.s32.totalorder %v1039_v62, 4 }
  0xb5   :  { %v362_v22 = vsel %vm359_vm8, %v828_v46, %v356_v40  ;;  %v408_v31 = vmul.f32 %v399_v13, %v320_v57  ;;  %v367_v3 = vsel %vm364_vm7, %v836_v50, %v361_v36  ;;  %vm370_vm15 = vcmp.eq.s32.totalorder %v1030_v49, 5  ;;  %vm334_vm7 = vmand %vm328_vm9, %vm331_vm11 }
  0xb6   :  { %v368_v8 = vsel %vm365_vm14, %v836_v50, %v362_v22  ;;  %vm371_vm0 = vcmp.eq.s32.totalorder %v1039_v62, 5  ;;  %v373_v47 = vsel %vm370_vm15, %v844_v54, %v367_v3  ;;  %vm376_vm1 = vcmp.eq.s32.totalorder %v1030_v49, 6  ;;  %vm335_vm15 = vmand %vm329_vm4, %vm332_vm5 }
  0xb7   :  { %vm377_vm6 = vcmp.eq.s32.totalorder %v1039_v62, 6  ;;  %v1199_v6 = vadd.f32 %v408_v31, %v299_v53  ;;  %v374_v12 = vsel %vm371_vm0, %v844_v54, %v368_v8  ;;  %v379_v15 = vsel %vm376_vm1, %v854_v58, %v373_v47 }
  0xb8   :  { %vm382_vm10 = vcmp.eq.s32.totalorder %v1030_v49, 7  ;;  %v380_v35 = vsel %vm377_vm6, %v854_v58, %v374_v12  ;;  %vm383_vm3 = vcmp.eq.s32.totalorder %v1039_v62, 7  ;;  %vm388_vm8 = vcmp.eq.s32.totalorder %v1030_v49, 8 }
  0xb9   :  { %v385_v0 = vsel %vm382_vm10, %v860_v60, %v379_v15  ;;  %v1210_v51 = vadd.s32 %v1073_v23, %v787_v30  ;;  %v386_v53 = vsel %vm383_vm3, %v860_v60, %v380_v35  ;;  %vm389_vm14 = vcmp.eq.s32.totalorder %v1039_v62, 8 }
  0xba   :  { %v391_v56 = vsel %vm388_vm8, %v884_v11, %v385_v0  ;;  %v1221_v57 = vadd.s32 %v1078_v32, %v784_v29  ;;  %v392_v30 = vsel %vm389_vm14, %v884_v11, %v386_v53  ;;  %v319_v14 = vsel %vm308_vm12, %v1107_v7, %v315_v27 }
  0xbb   :  { %v394_v49 = vsel %vm334_vm7, %v391_v56, 0.0  ;;  %v395_v61 = vsel %vm335_vm15, %v392_v30, 0.0  ;;  %v318_v29 = vsel %vm308_vm12, %v315_v27, %v1143_v44  ;;  %vm451_vm9 = vcmp.eq.s32.totalorder %v1043_v63, 0 }
  0xbc   :  { %v403_v62 = vrot.slane %v394_v49, %v963_v55  ;;  %v407_v59 = vrot.slane %v395_v61, %v963_v55  ;;  %vm439_vm11 = vcmp.ge.s32.totalorder %v1004_v17, 0  ;;  %v454_v16 = vsel %vm451_vm9, %v804_v34, 0.0 }
  0xbd   :  { %vm457_vm4 = vcmp.eq.s32.totalorder %v1043_v63, 1  ;;  %vm442_vm5 = vcmp.le.s32.totalorder %v1004_v17, 2  ;;  %vm463_vm0 = vcmp.eq.s32.totalorder %v1043_v63, 2  ;;  %vm469_vm12 = vcmp.eq.s32.totalorder %v1043_v63, 3 }
  0xbe   :  { %v409_v52 = vmul.f32 %v403_v62, %v319_v14  ;;  %v460_v7 = vsel %vm457_vm4, %v812_v38, %v454_v16  ;;  %v410_v5 = vmul.f32 %v407_v59, %v318_v29  ;;  %vm475_vm1 = vcmp.eq.s32.totalorder %v1043_v63, 4  ;;  %v429_v14 = vpop.permute.xlu0 %428  ;;  %v1310_v62 = vpop.permute.xlu1 %536 }
  0xbf   :  { %v466_v44 = vsel %vm463_vm0, %v820_v42, %v460_v7  ;;  %vm481_vm6 = vcmp.eq.s32.totalorder %v1043_v63, 5  ;;  %vm487_vm10 = vcmp.eq.s32.totalorder %v1043_v63, 6  ;;  %vm493_vm3 = vcmp.eq.s32.totalorder %v1043_v63, 7 }
  0xc0   :  { %v1251_v18 = vadd.f32 %v409_v52, %v1084_v33  ;;  %v472_v19 = vsel %vm469_vm12, %v828_v46, %v466_v44  ;;  %v1257_v21 = vadd.f32 %v410_v5, %v1151_v48  ;;  %vm499_vm8 = vcmp.eq.s32.totalorder %v1043_v63, 8 }
  0xc1   :  { %v478_v13 = vsel %vm475_vm1, %v836_v50, %v472_v19  ;;  %v431_v33 = vsel %vm420_vm13, %v1248_v41, %v1243_v9  ;;  %vm440_vm7 = vcmp.ge.s32.totalorder %v1022_v39, 0  ;;  %vm443_vm14 = vcmp.le.s32.totalorder %v1022_v39, 2 }
  0xc2   :  { %v484_v40 = vsel %vm481_vm6, %v844_v54, %v478_v13  ;;  %vm441_vm15 = vcmp.ge.s32.totalorder %v1025_v43, 0  ;;  %vm444_vm9 = vcmp.le.s32.totalorder %v1025_v43, 2  ;;  %vm452_vm4 = vcmp.eq.s32.totalorder %v1058_v2, 0  ;;  %vm445_vm6 = vmand %vm439_vm11, %vm442_vm5  ;;  %v1351_v13 = vpop.permute.xlu1 %540 }
  0xc3   :  { %v490_v48 = vsel %vm487_vm10, %v854_v58, %v484_v40  ;;  %vm453_vm0 = vcmp.eq.s32.totalorder %v1062_v10, 0  ;;  %vm458_vm12 = vcmp.eq.s32.totalorder %v1058_v2, 1  ;;  %v455_v22 = vsel %vm452_vm4, %v804_v34, 0.0 }
  0xc4   :  { %v496_v36 = vsel %vm493_vm3, %v860_v60, %v490_v48  ;;  %v456_v31 = vsel %vm453_vm0, %v804_v34, 0.0  ;;  %vm459_vm1 = vcmp.eq.s32.totalorder %v1062_v10, 1  ;;  %v461_v8 = vsel %vm458_vm12, %v812_v38, %v455_v22 }
  0xc5   :  { %v502_v3 = vsel %vm499_vm8, %v884_v11, %v496_v36  ;;  %v462_v47 = vsel %vm459_vm1, %v812_v38, %v456_v31  ;;  %vm464_vm10 = vcmp.eq.s32.totalorder %v1058_v2, 2  ;;  %vm465_vm3 = vcmp.eq.s32.totalorder %v1062_v10, 2 }
  0xc6   :  { %v505_v12 = vsel %vm445_vm6, %v502_v3, 0.0  ;;  %v467_v15 = vsel %vm464_vm10, %v820_v42, %v461_v8  ;;  %vm470_vm4 = vcmp.eq.s32.totalorder %v1058_v2, 3  ;;  %v468_v27 = vsel %vm465_vm3, %v820_v42, %v462_v47 }
  0xc7   :  { %v511_v17 = vrot.slane %v505_v12, %v963_v55  ;;  %vm471_vm11 = vcmp.eq.s32.totalorder %v1062_v10, 3  ;;  %v473_v63 = vsel %vm470_vm4, %v828_v46, %v467_v15  ;;  %vm476_vm5 = vcmp.eq.s32.totalorder %v1058_v2, 4 }
  0xc8   :  { %v474_v35 = vsel %vm471_vm11, %v828_v46, %v468_v27  ;;  %vm477_vm8 = vcmp.eq.s32.totalorder %v1062_v10, 4  ;;  %vm482_vm0 = vcmp.eq.s32.totalorder %v1058_v2, 5  ;;  %v479_v53 = vsel %vm476_vm5, %v836_v50, %v473_v63  ;;  %vm446_vm11 = vmand %vm440_vm7, %vm443_vm14 }
  0xc9   :  { %v520_v0 = vmul.f32 %v511_v17, %v431_v33  ;;  %v480_v56 = vsel %vm477_vm8, %v836_v50, %v474_v35  ;;  %vm483_vm12 = vcmp.eq.s32.totalorder %v1062_v10, 5  ;;  %v485_v30 = vsel %vm482_vm0, %v844_v54, %v479_v53  ;;  %vm447_vm8 = vmand %vm441_vm15, %vm444_vm9 }
  0xca   :  { %v486_v49 = vsel %vm483_vm12, %v844_v54, %v480_v56  ;;  %vm488_vm1 = vcmp.eq.s32.totalorder %v1058_v2, 6  ;;  %vm489_vm6 = vcmp.eq.s32.totalorder %v1062_v10, 6  ;;  %vm494_vm10 = vcmp.eq.s32.totalorder %v1058_v2, 7 }
  0xcb   :  { %v1308_v61 = vadd.f32 %v520_v0, %v1199_v6  ;;  %v491_v29 = vsel %vm488_vm1, %v854_v58, %v485_v30  ;;  %v492_v59 = vsel %vm489_vm6, %v854_v58, %v486_v49  ;;  %v1317_v16 = vadd.s32 %v1090_v37, %v781_v28 }
  0xcc   :  { %vm495_vm3 = vcmp.eq.s32.totalorder %v1062_v10, 7  ;;  %v497_v52 = vsel %vm494_vm10, %v860_v60, %v491_v29  ;;  %vm500_vm4 = vcmp.eq.s32.totalorder %v1058_v2, 8  ;;  %vm501_vm5 = vcmp.eq.s32.totalorder %v1062_v10, 8 }
  0xcd   :  { %v498_v6 = vsel %vm495_vm3, %v860_v60, %v492_v59  ;;  %v503_v7 = vsel %vm500_vm4, %v884_v11, %v497_v52  ;;  %v430_v28 = vsel %vm420_vm13, %v1243_v9, %v429_v14  ;;  %v432_v39 = vsel %vm420_vm13, %v429_v14, %v1248_v41 }
  0xce   :  { %v504_v2 = vsel %vm501_vm5, %v884_v11, %v498_v6  ;;  %v506_v5 = vsel %vm446_vm11, %v503_v7, 0.0  ;;  %vm553_vm7 = vcmp.ge.s32.totalorder %v1073_v23, 0  ;;  %vm565_vm14 = vcmp.eq.s32.totalorder %v1210_v51, 0 }
  0xcf   :  { %v507_v10 = vsel %vm447_vm8, %v504_v2, 0.0  ;;  %v515_v44 = vrot.slane %v506_v5, %v963_v55  ;;  %vm571_vm0 = vcmp.eq.s32.totalorder %v1210_v51, 1  ;;  %vm556_vm15 = vcmp.le.s32.totalorder %v1073_v23, 2 }
  0xd0   :  { %v519_v9 = vrot.slane %v507_v10, %v963_v55  ;;  %v568_v43 = vsel %vm565_vm14, %v804_v34, 0.0  ;;  %vm577_vm9 = vcmp.eq.s32.totalorder %v1210_v51, 2  ;;  %vm583_vm13 = vcmp.eq.s32.totalorder %v1210_v51, 3 }
  0xd1   :  { %v521_v19 = vmul.f32 %v515_v44, %v430_v28  ;;  %v574_v41 = vsel %vm571_vm0, %v812_v38, %v568_v43  ;;  %vm589_vm12 = vcmp.eq.s32.totalorder %v1210_v51, 4  ;;  %vm595_vm1 = vcmp.eq.s32.totalorder %v1210_v51, 5 }
  0xd2   :  { %v522_v40 = vmul.f32 %v519_v9, %v432_v39  ;;  %v580_v33 = vsel %vm577_vm9, %v820_v42, %v574_v41  ;;  %vm601_vm6 = vcmp.eq.s32.totalorder %v1210_v51, 6  ;;  %vm607_vm10 = vcmp.eq.s32.totalorder %v1210_v51, 7 }
  0xd3   :  { %v1357_v48 = vadd.f32 %v521_v19, %v1251_v18  ;;  %v586_v36 = vsel %vm583_vm13, %v828_v46, %v580_v33  ;;  %vm613_vm3 = vcmp.eq.s32.totalorder %v1210_v51, 8  ;;  %v544_v3 = vsel %vm532_vm2, %v1351_v13, %v1310_v62 }
  0xd4   :  { %v525_v22 = vadd.f32 %v522_v40, %v1257_v21  ;;  %v592_v31 = vsel %vm589_vm12, %v836_v50, %v586_v36  ;;  %vm551_vm4 = vcmp.ge.s32.totalorder %v1078_v32, 0  ;;  %vm552_vm11 = vcmp.ge.s32.totalorder %v1090_v37, 0 }
  0xd5   :  { %v598_v18 = vsel %vm595_vm1, %v844_v54, %v592_v31  ;;  %vm554_vm5 = vcmp.le.s32.totalorder %v1078_v32, 2  ;;  %vm555_vm8 = vcmp.le.s32.totalorder %v1090_v37, 2  ;;  %vm563_vm14 = vcmp.eq.s32.totalorder %v1221_v57, 0 }
  0xd6   :  { %v604_v21 = vsel %vm601_vm6, %v854_v58, %v598_v18  ;;  %vm564_vm0 = vcmp.eq.s32.totalorder %v1317_v16, 0  ;;  %v566_v8 = vsel %vm563_vm14, %v804_v34, 0.0  ;;  %vm569_vm9 = vcmp.eq.s32.totalorder %v1221_v57, 1  ;;  %vm559_vm6 = vmand %vm553_vm7, %vm556_vm15 }
  0xd7   :  { %v610_v47 = vsel %vm607_vm10, %v860_v60, %v604_v21  ;;  %vm94_vm13 = vcmp.eq.s32.totalorder %v776_v26, 1  ;;  %vm95_vm12 = vcmp.eq.s32.totalorder %v774_v25, 1  ;;  %v567_v12 = vsel %vm564_vm0, %v804_v34, 0.0 }
  0xd8   :  { %vm570_vm1 = vcmp.eq.s32.totalorder %v1317_v16, 1  ;;  %v572_v15 = vsel %vm569_vm9, %v812_v38, %v566_v8  ;;  %v616_v17 = vsel %vm613_vm3, %v884_v11, %v610_v47  ;;  %vm575_vm10 = vcmp.eq.s32.totalorder %v1221_v57, 2 }
  0xd9   :  { %v573_v27 = vsel %vm570_vm1, %v812_v38, %v567_v12  ;;  %vm576_vm14 = vcmp.eq.s32.totalorder %v1317_v16, 2  ;;  %v619_v34 = vsel %vm559_vm6, %v616_v17, 0.0  ;;  %v578_v63 = vsel %vm575_vm10, %v820_v42, %v572_v15 }
  0xda   :  { %v579_v35 = vsel %vm576_vm14, %v820_v42, %v573_v27  ;;  %vm581_vm0 = vcmp.eq.s32.totalorder %v1221_v57, 3  ;;  %v631_v23 = vrot.slane %v619_v34, %v963_v55  ;;  %vm91_vm7 = vcmp.eq.s32.totalorder %v776_v26, 0 }
  0xdb   :  { %vm582_vm15 = vcmp.eq.s32.totalorder %v1317_v16, 3  ;;  %v584_v51 = vsel %vm581_vm0, %v828_v46, %v578_v63  ;;  %vm587_vm3 = vcmp.eq.s32.totalorder %v1221_v57, 4  ;;  %vm588_vm9 = vcmp.eq.s32.totalorder %v1317_v16, 4 }
  0xdc   :  { %v585_v38 = vsel %vm582_vm15, %v828_v46, %v579_v35  ;;  %v590_v0 = vsel %vm587_vm3, %v836_v50, %v584_v51  ;;  %vm593_vm1 = vcmp.eq.s32.totalorder %v1221_v57, 5  ;;  %v634_v42 = vmul.f32 %v631_v23, %v544_v3  ;;  %vm1420_vm3 = vmand %vm551_vm4, %vm554_vm5 }
  0xdd   :  { %v591_v53 = vsel %vm588_vm9, %v836_v50, %v585_v38  ;;  %vm594_vm6 = vcmp.eq.s32.totalorder %v1317_v16, 5  ;;  %v596_v56 = vsel %vm593_vm1, %v844_v54, %v590_v0  ;;  %vm599_vm10 = vcmp.eq.s32.totalorder %v1221_v57, 6  ;;  %v539_v50 = vpop.permute.xlu0 %538  ;;  %vm558_vm4 = vmand %vm552_vm11, %vm555_vm8 }
  0xde   :  { %v597_v30 = vsel %vm594_vm6, %v844_v54, %v591_v53  ;;  %vm600_vm14 = vcmp.eq.s32.totalorder %v1317_v16, 6  ;;  %vm605_vm0 = vcmp.eq.s32.totalorder %v1221_v57, 7  ;;  %v637_v46 = vadd.f32 %v634_v42, %v525_v22 }
  0xdf   :  { %v602_v49 = vsel %vm599_vm10, %v854_v58, %v596_v56  ;;  %v603_v14 = vsel %vm600_vm14, %v854_v58, %v597_v30  ;;  %vm606_vm15 = vcmp.eq.s32.totalorder %v1317_v16, 7  ;;  %vm611_vm9 = vcmp.eq.s32.totalorder %v1221_v57, 8 }
  0xe0   :  { %v608_v29 = vsel %vm605_vm0, %v860_v60, %v602_v49  ;;  %v609_v59 = vsel %vm606_vm15, %v860_v60, %v603_v14  ;;  %vm612_vm1 = vcmp.eq.s32.totalorder %v1317_v16, 8  ;;  %v640_v58 = vadd.f32 %v637_v46, %v977_v4 }
  0xe1   :  { %vm92_vm6 = vcmp.eq.s32.totalorder %v774_v25, 0  ;;  %v614_v32 = vsel %vm611_vm9, %v884_v11, %v608_v29  ;;  %v615_v52 = vsel %vm612_vm1, %v884_v11, %v609_v59  ;;  %v542_v57 = vsel %vm532_vm2, %v539_v50, %v1351_v13 }
  0xe2   :  { %v617_v60 = vsel %vm1420_vm3, %v614_v32, 0.0  ;;  %v618_v6 = vsel %vm558_vm4, %v615_v52, 0.0  ;;  %v543_v4 = vsel %vm532_vm2, %v1310_v62, %v539_v50  ;;  %643 = vst [vmem:[%s1473_s2 + $0x10] sm:$0xff] %v640_v58  ;;  %v99_v11 = vsel %vm94_vm13, %v913_v20, %v922_v24 }
  0xe3   :  { %v100_v37 = vsel %vm95_vm12, %v913_v20, %v922_v24  ;;  %v623_v16 = vrot.slane %v617_v60, %v963_v55  ;;  %v627_v7 = vrot.slane %v618_v6, %v963_v55  ;;  %v103_v28 = vsel %vm91_vm7, %v946_v45, %v99_v11 }
  0xe4   :  { %v104_v2 = vsel %vm92_vm6, %v946_v45, %v100_v37 }
  0xe5   :  { %v632_v1 = vmul.f32 %v623_v16, %v543_v4  ;;  %v633_v62 = vmul.f32 %v627_v7, %v542_v57 }
  0xe7   :  { %v635_v5 = vadd.f32 %v632_v1, %v1308_v61  ;;  %v636_v39 = vadd.f32 %v633_v62, %v1357_v48 }
  0xe9   :  { %v638_v10 = vadd.f32 %v635_v5, %v103_v28  ;;  %v639_v20 = vadd.f32 %v636_v39, %v104_v2 }
  0xeb   :  { %641 = vst [vmem:[%s1473_s2] sm:$0xff] %v638_v10  ;;  %642 = vst [vmem:[%s1473_s2 + $0x8] sm:$0xff] %v639_v20 }
  0xec   :  { %648 = vsyncpa [#allocation3], 1 }

</bundles_post_ra>
